<compile_context>
chip_gen: v5e
topology: v5e:2x2
jax: 0.10.0
libtpu: 0.0.40
codegen_flags: <defaults>
</compile_context>

<pallas_src>
import functools

import jax
import jax.numpy as jnp
from jax.experimental import pallas as pl
from jax.experimental.pallas import tpu as pltpu

LANE = 128     # vreg lane width
SUBLANE = 8    # f32 sublane count


def mlp_kernel(x_ref, w1_ref, b1_ref, w2_ref, b2_ref, o_ref):
    # fc1 + relu: MXU matmul with f32 accumulation, VPU bias-add + relu.
    h = jnp.dot(x_ref[...], w1_ref[...], preferred_element_type=jnp.float32)
    h = jnp.maximum(h + b1_ref[...], 0.0)
    # fc2 + relu.
    y = jnp.dot(h, w2_ref[...], preferred_element_type=jnp.float32)
    o_ref[...] = jnp.maximum(y + b2_ref[...], 0.0)


def _round_up(x, m):
    return pl.cdiv(x, m) * m


@functools.partial(jax.jit, static_argnames=("batch_tile",))
def team_success_forward(x, w1, b1, w2, b2, *, batch_tile=2048):
    """x: (B, D_in) f32; w1: (D_in, H); b1: (1, H); w2: (H, H); b2: (1, H)."""
    B, D_in = x.shape
    H = w1.shape[1]

    # Only the hidden/output width is lane-padded; x's feature dim stays D_in.
    H_pad = _round_up(H, LANE)

    # Batch tile: large enough to amortize per-step pipeline overhead, multiple
    # of 8 sublanes, capped at ~half the batch so the grid keeps >= 2 steps
    # (keeps both v7x TensorCores busy; harmless on v5e/v6e).
    TB = _round_up(batch_tile, SUBLANE)
    TB = min(TB, max(_round_up(pl.cdiv(B, 2), SUBLANE), SUBLANE))
    grid = (pl.cdiv(B, TB),)

    # Tiny, one-time zero-padding of weights/biases (semantics-preserving:
    # padded hidden units compute relu(0) = 0 and contribute nothing).
    w1_p = jnp.pad(w1, ((0, 0), (0, H_pad - H)))
    b1_p = jnp.pad(b1, ((0, 0), (0, H_pad - H)))
    w2_p = jnp.pad(w2, ((0, H_pad - H), (0, H_pad - H)))
    b2_p = jnp.pad(b2, ((0, 0), (0, H_pad - H)))

    itemsize = 4  # f32
    cost = pl.CostEstimate(
        flops=2 * B * (D_in * H_pad + H_pad * H_pad),
        transcendentals=0,
        bytes_accessed=itemsize
        * (B * D_in + D_in * H_pad + H_pad + H_pad * H_pad + H_pad + B * H_pad),
    )

    out_p = pl.pallas_call(
        mlp_kernel,
        out_shape=jax.ShapeDtypeStruct((B, H_pad), jnp.float32),
        grid=grid,
        in_specs=[
            # x streamed over batch tiles, unpadded feature dim (full-extent
            # last block dim is legal); double-buffered by the pipeline.
            pl.BlockSpec((TB, D_in), lambda i: (i, 0)),
            # Weights / biases weight-stationary: constant index_maps keep them
            # resident in VMEM across the grid.
            pl.BlockSpec((D_in, H_pad), lambda i: (0, 0)),
            pl.BlockSpec((1, H_pad), lambda i: (0, 0)),
            pl.BlockSpec((H_pad, H_pad), lambda i: (0, 0)),
            pl.BlockSpec((1, H_pad), lambda i: (0, 0)),
        ],
        out_specs=pl.BlockSpec((TB, H_pad), lambda i: (i, 0)),
        compiler_params=pltpu.CompilerParams(
            # Independent batch tiles: shard across TensorCores on v7x.
            dimension_semantics=("parallel",),
        ),
        cost_estimate=cost,
    )(x, w1_p, b1_p, w2_p, b2_p)

    # Only the lane padding needs slicing away (batch dim is exact).
    return out_p[:, :H]


if __name__ == "__main__":
    # Small shapes consistent with the module: batch=8, input_dim=16, hidden_dim=32.
    B, D_IN, H = 8, 16, 32

    key = jax.random.PRNGKey(0)
    kx, kw1, kb1, kw2, kb2 = jax.random.split(key, 5)

    x = jax.random.normal(kx, (B, D_IN), dtype=jnp.float32)

    # Deterministic nn.Linear-like init (uniform(-1/sqrt(fan_in), +1/sqrt(fan_in))),
    # stored pre-transposed relative to torch's (out, in) convention.
    lim1 = 1.0 / jnp.sqrt(D_IN)
    lim2 = 1.0 / jnp.sqrt(H)
    w1 = jax.random.uniform(kw1, (D_IN, H), minval=-lim1, maxval=lim1, dtype=jnp.float32)
    b1 = jax.random.uniform(kb1, (1, H), minval=-lim1, maxval=lim1, dtype=jnp.float32)
    w2 = jax.random.uniform(kw2, (H, H), minval=-lim2, maxval=lim2, dtype=jnp.float32)
    b2 = jax.random.uniform(kb2, (1, H), minval=-lim2, maxval=lim2, dtype=jnp.float32)

    out = jax.block_until_ready(team_success_forward(x, w1, b1, w2, b2))

    # Pure-JAX reference (high-precision matmuls so both sides are ~f32 accurate).
    hp = jax.lax.Precision.HIGHEST
    ref = jnp.maximum(
        jnp.dot(jnp.maximum(jnp.dot(x, w1, precision=hp) + b1, 0.0), w2, precision=hp)
        + b2, 0.0)
    assert out.shape == (B, H)
    assert jnp.allclose(out, ref, atol=2e-5, rtol=2e-5)

    # Sanity-check the gridded / partial-edge-block path with a larger batch
    # that is not a multiple of the tile size.
    B2 = 1000
    x2 = jax.random.normal(jax.random.PRNGKey(1), (B2, D_IN), dtype=jnp.float32)
    out2 = jax.block_until_ready(team_success_forward(x2, w1, b1, w2, b2))
    ref2 = jnp.maximum(
        jnp.dot(jnp.maximum(jnp.dot(x2, w1, precision=hp) + b1, 0.0), w2, precision=hp)
        + b2, 0.0)
    assert out2.shape == (B2, H)
    assert jnp.allclose(out2, ref2, atol=2e-5, rtol=2e-5)

    print("KERNEL_OK")
</pallas_src>

<mosaic_0001>
module attributes {stable_mosaic.version = 11 : i64} {
  func.func @mlp_kernel(%arg0: i32, %arg1: memref<8x16xf32, #tpu.memory_space<vmem>>, %arg2: memref<16x128xf32, #tpu.memory_space<vmem>>, %arg3: memref<1x128xf32, #tpu.memory_space<vmem>>, %arg4: memref<128x128xf32, #tpu.memory_space<vmem>>, %arg5: memref<1x128xf32, #tpu.memory_space<vmem>>, %arg6: memref<8x128xf32, #tpu.memory_space<vmem>>) attributes {dimension_semantics = [#tpu.dimension_semantics<parallel>], iteration_bounds = array<i64: 1>, scalar_prefetch = 0 : i64, scratch_operands = 0 : i64, tpu.core_type = #tpu.core_type<tc>, window_params = [{transform_indices = @transform_0, window_bounds = array<i64: 8, 16>}, {pipeline_mode = #tpu.pipeline_mode<synchronous>, transform_indices = @transform_1, window_bounds = array<i64: 16, 128>}, {pipeline_mode = #tpu.pipeline_mode<synchronous>, transform_indices = @transform_2, window_bounds = array<i64: 1, 128>}, {pipeline_mode = #tpu.pipeline_mode<synchronous>, transform_indices = @transform_3, window_bounds = array<i64: 128, 128>}, {pipeline_mode = #tpu.pipeline_mode<synchronous>, transform_indices = @transform_4, window_bounds = array<i64: 1, 128>}, {transform_indices = @transform_5, window_bounds = array<i64: 8, 128>}]} {
    %c0 = arith.constant 0 : index
    %c0_0 = arith.constant 0 : index
    %0 = vector.load %arg1[%c0, %c0_0] : memref<8x16xf32, #tpu.memory_space<vmem>>, vector<8x16xf32>
    %c0_1 = arith.constant 0 : index
    %c0_2 = arith.constant 0 : index
    %1 = vector.load %arg2[%c0_1, %c0_2] : memref<16x128xf32, #tpu.memory_space<vmem>>, vector<16x128xf32>
    %cst = arith.constant dense<0.000000e+00> : vector<8x128xf32>
    %2 = tpu.matmul %0, %1, %cst {dimension_numbers = #tpu.dot_dimension_numbers<[1], [0], [0], [1], [0, 0, 1, 1], [], []>} : vector<8x16xf32>, vector<16x128xf32>, vector<8x128xf32> -> vector<8x128xf32>
    %c0_3 = arith.constant 0 : index
    %c0_4 = arith.constant 0 : index
    %3 = vector.load %arg3[%c0_3, %c0_4] : memref<1x128xf32, #tpu.memory_space<vmem>>, vector<1x128xf32>
    %4 = vector.broadcast %3 : vector<1x128xf32> to vector<8x128xf32>
    %5 = arith.addf %2, %4 : vector<8x128xf32>
    %cst_5 = arith.constant 0.000000e+00 : f32
    %6 = vector.broadcast %cst_5 : f32 to vector<8x128xf32>
    %7 = arith.maximumf %5, %6 : vector<8x128xf32>
    %c0_6 = arith.constant 0 : index
    %c0_7 = arith.constant 0 : index
    %8 = vector.load %arg4[%c0_6, %c0_7] : memref<128x128xf32, #tpu.memory_space<vmem>>, vector<128x128xf32>
    %cst_8 = arith.constant dense<0.000000e+00> : vector<8x128xf32>
    %9 = tpu.matmul %7, %8, %cst_8 {dimension_numbers = #tpu.dot_dimension_numbers<[1], [0], [0], [1], [0, 0, 1, 1], [], []>} : vector<8x128xf32>, vector<128x128xf32>, vector<8x128xf32> -> vector<8x128xf32>
    %c0_9 = arith.constant 0 : index
    %c0_10 = arith.constant 0 : index
    %10 = vector.load %arg5[%c0_9, %c0_10] : memref<1x128xf32, #tpu.memory_space<vmem>>, vector<1x128xf32>
    %11 = vector.broadcast %10 : vector<1x128xf32> to vector<8x128xf32>
    %12 = arith.addf %9, %11 : vector<8x128xf32>
    %cst_11 = arith.constant 0.000000e+00 : f32
    %13 = vector.broadcast %cst_11 : f32 to vector<8x128xf32>
    %14 = arith.maximumf %12, %13 : vector<8x128xf32>
    %c0_12 = arith.constant 0 : index
    %c0_13 = arith.constant 0 : index
    %15 = vector.load %arg6[%c0_12, %c0_13] : memref<8x128xf32, #tpu.memory_space<vmem>>, vector<8x128xf32>
    tpu.vector_store %arg6[%c0_12, %c0_13], %14 {strides = array<i32>} : memref<8x128xf32, #tpu.memory_space<vmem>>, vector<8x128xf32>,
    return
  }
  func.func @transform_0(%arg0: i32) -> (i32, i32) {
    %c0_i32 = arith.constant 0 : i32
    %c0_i32_0 = arith.constant 0 : i32
    return %arg0, %c0_i32 : i32, i32
  }
  func.func @transform_1(%arg0: i32) -> (i32, i32) {
    %c0_i32 = arith.constant 0 : i32
    %c0_i32_0 = arith.constant 0 : i32
    %c0_i32_1 = arith.constant 0 : i32
    return %c0_i32, %c0_i32_0 : i32, i32
  }
  func.func @transform_2(%arg0: i32) -> (i32, i32) {
    %c0_i32 = arith.constant 0 : i32
    %c0_i32_0 = arith.constant 0 : i32
    %c0_i32_1 = arith.constant 0 : i32
    return %c0_i32, %c0_i32_0 : i32, i32
  }
  func.func @transform_3(%arg0: i32) -> (i32, i32) {
    %c0_i32 = arith.constant 0 : i32
    %c0_i32_0 = arith.constant 0 : i32
    %c0_i32_1 = arith.constant 0 : i32
    return %c0_i32, %c0_i32_0 : i32, i32
  }
  func.func @transform_4(%arg0: i32) -> (i32, i32) {
    %c0_i32 = arith.constant 0 : i32
    %c0_i32_0 = arith.constant 0 : i32
    %c0_i32_1 = arith.constant 0 : i32
    return %c0_i32, %c0_i32_0 : i32, i32
  }
  func.func @transform_5(%arg0: i32) -> (i32, i32) {
    %c0_i32 = arith.constant 0 : i32
    %c0_i32_0 = arith.constant 0 : i32
    return %arg0, %c0_i32 : i32, i32
  }
}

</mosaic_0001>

<bundles_post_ra>
// kernel: team_success_forward.1
= control target key start
LH: loop header
LB: loop body
LE: loop exit
PB: predicated region body
PF: predicated region fallthrough
CT: control target
= control target key end

     0   :  { %vm28_vm0 = vcmask 130048   ;;  %s238_s0 = inlined_call_operand.vmem [shape: f32[8,16], index: 0, kind: input, shape index: {}]   ;;  %s239_s1 = inlined_call_operand.vmem [shape: f32[16,128], index: 1, kind: input, shape index: {}]   ;;  %s240_s2 = inlined_call_operand.vmem [shape: f32[1,128], index: 2, kind: input, shape index: {}]   ;;  %s241_s3 = inlined_call_operand.vmem [shape: f32[128,128], index: 3, kind: input, shape index: {}]   ;;  %s242_s4 = inlined_call_operand.vmem [shape: f32[1,128], index: 4, kind: input, shape index: {}]   ;;  %s243_s5 = inlined_call_operand.hbm [shape: f32[8,128], index: 5, kind: output, shape index: {}]  }
   0x1   :  { %v23_v0 = vld [vmem:[%s239_s1 + $0x8] sm:$0xff]  ;;  %v22_v1 = vld [vmem:[%s239_s1] sm:$0xff]  ;;  %v68_v3 = vld [vmem:[%s241_s3 + $0x78] sm:$0xff] }
   0x2   :  { %46 = vmatpush.msra.mxu0 %v23_v0  ;;  %v21_v2 = vld [vmem:[%s238_s0] sm:$0xff]  ;;  %v67_v4 = vld [vmem:[%s241_s3 + $0x70] sm:$0xff]  ;;  %73 = vmatpush.msra.mxu1 %v68_v3  ;;  %v66_v5 = vld [vmem:[%s241_s3 + $0x68] sm:$0xff] }
   0x3   :  { %v65_v6 = vld [vmem:[%s241_s3 + $0x60] sm:$0xff] }
   0x4   :  { %47 = vmatpush.msra.mxu0 %v22_v1  ;;  %74 = vmatpush.msra.mxu1 %v67_v4 }
   0x5   :  { %111 = vmatmul.msk.f32.vlgmr.msra.gmra.mxu0 %vm28_vm0, %v21_v2 }
   0x6   :  { %75 = vmatpush.msra.mxu1 %v66_v5 }
   0x7   :  { %10 = vsyncpa [#allocation3], 0  ;;  %v64_v7 = vld [vmem:[%s241_s3 + $0x58] sm:$0xff]  ;;  %v63_v8 = vld [vmem:[%s241_s3 + $0x50] sm:$0xff]  ;;  %s141_s6 = smov [#allocation2]  }
   0x8   :  { %76 = vmatpush.msra.mxu1 %v65_v6  ;;  %v62_v9 = vld [vmem:[%s241_s3 + $0x48] sm:$0xff]  ;;  %v61_v10 = vld [vmem:[%s241_s3 + $0x40] sm:$0xff]  ;;  %v60_v11 = vld [vmem:[%s241_s3 + $0x38] sm:$0xff]  ;;  %s100_s7 = sshll.u32 %s141_s6, 4  ;;  %s101_s7 = int_to_ptr.vmem [resolvable:$true] %s100_s7 }
   0x9   :  { %v59_v12 = vld [vmem:[%s241_s3 + $0x30] sm:$0xff]  ;;  %v58_v13 = vld [vmem:[%s241_s3 + $0x28] sm:$0xff]  ;;  %v57_v14 = vld [vmem:[%s241_s3 + $0x20] sm:$0xff] }
   0xa   :  { %77 = vmatpush.msra.mxu1 %v64_v7  ;;  %v56_v15 = vld [vmem:[%s241_s3 + $0x18] sm:$0xff]  ;;  %v55_v16 = vld [vmem:[%s241_s3 + $0x10] sm:$0xff]  ;;  %v54_v17 = vld [vmem:[%s241_s3 + $0x8] sm:$0xff] }
   0xb   :  { %v53_v18 = vld [vmem:[%s241_s3] sm:$0xff]  ;;  %s102_s3 = sshll.u32 %s243_s5, 4  ;;  %s103_s3 = int_to_ptr.hbm [resolvable:$true] %s102_s3 }
   0xc   :  { %78 = vmatpush.msra.mxu1 %v63_v8  ;;  %v113_v19 = vld [vmem:[%s240_s2] ss:$0 sm:$0xff] }
   0xd   :  { %v114_v23 = vld [vmem:[%s242_s4] ss:$0 sm:$0xff] }
   0xe   :  { %79 = vmatpush.msra.mxu1 %v62_v9 }
  0x10   :  { %80 = vmatpush.msra.mxu1 %v61_v10 }
  0x12   :  { %81 = vmatpush.msra.mxu1 %v60_v11 }
  0x14   :  { %82 = vmatpush.msra.mxu1 %v59_v12 }
  0x16   :  { %83 = vmatpush.msra.mxu1 %v58_v13 }
  0x18   :  { %84 = vmatpush.msra.mxu1 %v57_v14 }
  0x1a   :  { %85 = vmatpush.msra.mxu1 %v56_v15 }
  0x1c   :  { %86 = vmatpush.msra.mxu1 %v55_v16 }
  0x1e   :  { %87 = vmatpush.msra.mxu1 %v54_v17 }
  0x20   :  { %88 = vmatpush.msra.mxu1 %v53_v18 }
  0x82   :  { %v49_v20 = vpop.f32.mrf.mxu0 }
  0x83   :  { %v50_v21 = vadd.f32 %v113_v19, %v49_v20 }
  0x85   :  { %v52_v22 = vmax.f32 %v50_v21, 0.0 }
  0x87   :  { %89 = vmatmul.f32.vlgmr.msra.gmra.mxu1 %v52_v22 }
 0x104   :  { %v90_v24 = vpop.f32.mrf.mxu1 }
 0x105   :  { %v91_v25 = vadd.f32 %v114_v23, %v90_v24 }
 0x107   :  { %v93_v26 = vmax.f32 %v91_v25, 0.0 }
 0x109   :  { %94 = vst [vmem:[#allocation2] sm:$0xff] %v93_v26 }
 0x10a   :  { %105 = dma.vmem_to_hbm [thread:$0]  %s101_s7, 128, %s103_s3, [#allocation3]  }
 0x10b   :  { %139 = dma.done.wait [#allocation3], 128  }
 0x10c   :  { %140 = vsyncadd [#allocation3], 4294967168 }
 0x10d   :  { %110 = vsyncpa [#allocation3], 1 }

</bundles_post_ra>
